<compile_context>
chip_gen: v7x
topology: tpu7x:2x2x1
jax: 0.10.0
libtpu: 0.0.40
codegen_flags: <defaults>
</compile_context>

<pallas_src>
import jax
import jax.numpy as jnp
from jax.experimental import pallas as pl
from jax.experimental.pallas import tpu as pltpu


def _cross_kernel(x_ref, w_ref, b_ref, o_ref):
    # x_ref: (TR, D) row tile; w_ref / b_ref: (L, D) full parameter arrays.
    x0 = x_ref[...].astype(jnp.float32)                 # (TR, D)
    x = x0
    num_layers = w_ref.shape[0]
    for i in range(num_layers):                          # static unroll, L is small
        wi = w_ref[i:i + 1, :].astype(jnp.float32)       # (1, D)
        bi = b_ref[i:i + 1, :].astype(jnp.float32)       # (1, D)
        # xw[r] = sum_d x[r, d] * w_i[d]   -> VPU multiply + lane reduce
        xw = jnp.sum(x * wi, axis=-1, keepdims=True)     # (TR, 1)
        x = x0 * xw + bi + x
    o_ref[...] = x.astype(o_ref.dtype)


def cross_network(x, w, b, *, block_rows=4096):
    """Pallas CrossNetwork forward.

    x: (B, F, D) input
    w: (L, D)  stacked Linear_i weights (each PyTorch Linear(D, 1).weight row)
    b: (L, D)  stacked bias vectors
    Returns (B, F, D), same dtype as x (compute in f32).
    """
    B, F, D = x.shape
    L, Dw = w.shape
    assert Dw == D and b.shape == (L, D)

    R = B * F
    x2 = x.reshape(R, D)
    # Large row tiles amortize per-grid-step overhead; when R is small the tile
    # covers the whole array (block dims equal to full dims are always legal).
    TR = R if R <= block_rows else block_rows
    grid = (pl.cdiv(R, TR),)

    out = pl.pallas_call(
        _cross_kernel,
        out_shape=jax.ShapeDtypeStruct((R, D), x.dtype),
        grid=grid,
        in_specs=[
            pl.BlockSpec((TR, D), lambda r: (r, 0)),   # x tile
            pl.BlockSpec((L, D), lambda r: (0, 0)),    # all layer weights
            pl.BlockSpec((L, D), lambda r: (0, 0)),    # all layer biases
        ],
        out_specs=pl.BlockSpec((TR, D), lambda r: (r, 0)),
        compiler_params=pltpu.CompilerParams(
            dimension_semantics=("parallel",)),
    )(x2, w, b)
    return out.reshape(B, F, D)


def _ref_cross_network(x, w, b):
    """Pure-JAX reference mirroring the PyTorch forward."""
    x0 = x
    xi = x
    for i in range(w.shape[0]):
        xw = jnp.sum(xi * w[i][None, None, :], axis=-1, keepdims=True)
        xi = x0 * xw + b[i][None, None, :] + xi
    return xi


if __name__ == "__main__":
    B, F, D, L = 2, 4, 32, 3   # batch=2, num_fields=4, embed_dim=32, 3 cross layers
    key = jax.random.PRNGKey(0)
    kx, kw, kb = jax.random.split(key, 3)
    x = jax.random.normal(kx, (B, F, D), dtype=jnp.float32)
    w = jax.random.normal(kw, (L, D), dtype=jnp.float32) * 0.1
    b = jax.random.normal(kb, (L, D), dtype=jnp.float32) * 0.1

    out = cross_network(x, w, b)
    out = jax.block_until_ready(out)

    ref = _ref_cross_network(x, w, b)
    assert out.shape == (B, F, D), out.shape
    assert jnp.allclose(out, ref, atol=1e-5, rtol=1e-5), "mismatch vs reference"

    print("KERNEL_OK")
</pallas_src>

<mosaic_0001>
module attributes {stable_mosaic.version = 11 : i64} {
  func.func @_cross_kernel(%arg0: i32, %arg1: memref<8x32xf32, #tpu.memory_space<vmem>>, %arg2: memref<3x32xf32, #tpu.memory_space<vmem>>, %arg3: memref<3x32xf32, #tpu.memory_space<vmem>>, %arg4: memref<8x32xf32, #tpu.memory_space<vmem>>) attributes {dimension_semantics = [#tpu.dimension_semantics<parallel>], iteration_bounds = array<i64: 1>, scalar_prefetch = 0 : i64, scratch_operands = 0 : i64, tpu.core_type = #tpu.core_type<tc>, window_params = [{transform_indices = @transform_0, window_bounds = array<i64: 8, 32>}, {pipeline_mode = #tpu.pipeline_mode<synchronous>, transform_indices = @transform_1, window_bounds = array<i64: 3, 32>}, {pipeline_mode = #tpu.pipeline_mode<synchronous>, transform_indices = @transform_2, window_bounds = array<i64: 3, 32>}, {transform_indices = @transform_3, window_bounds = array<i64: 8, 32>}]} {
    %c0 = arith.constant 0 : index
    %c0_0 = arith.constant 0 : index
    %0 = vector.load %arg1[%c0, %c0_0] : memref<8x32xf32, #tpu.memory_space<vmem>>, vector<8x32xf32>
    %c0_1 = arith.constant 0 : index
    %c0_2 = arith.constant 0 : index
    %1 = vector.load %arg2[%c0_1, %c0_2] : memref<3x32xf32, #tpu.memory_space<vmem>>, vector<1x32xf32>
    %c0_3 = arith.constant 0 : index
    %c0_4 = arith.constant 0 : index
    %2 = vector.load %arg3[%c0_3, %c0_4] : memref<3x32xf32, #tpu.memory_space<vmem>>, vector<1x32xf32>
    %3 = vector.broadcast %1 : vector<1x32xf32> to vector<8x32xf32>
    %4 = arith.mulf %0, %3 : vector<8x32xf32>
    %cst = arith.constant dense<0.000000e+00> : vector<8xf32>
    %5 = vector.multi_reduction <add>, %4, %cst [1] : vector<8x32xf32> to vector<8xf32>
    %6 = vector.shape_cast %5 : vector<8xf32> to vector<8x1xf32>
    %7 = vector.broadcast %6 : vector<8x1xf32> to vector<8x32xf32>
    %8 = arith.mulf %0, %7 : vector<8x32xf32>
    %9 = vector.broadcast %2 : vector<1x32xf32> to vector<8x32xf32>
    %10 = arith.addf %8, %9 : vector<8x32xf32>
    %11 = arith.addf %10, %0 : vector<8x32xf32>
    %c1 = arith.constant 1 : index
    %c0_5 = arith.constant 0 : index
    %12 = vector.load %arg2[%c1, %c0_5] : memref<3x32xf32, #tpu.memory_space<vmem>>, vector<1x32xf32>
    %c1_6 = arith.constant 1 : index
    %c0_7 = arith.constant 0 : index
    %13 = vector.load %arg3[%c1_6, %c0_7] : memref<3x32xf32, #tpu.memory_space<vmem>>, vector<1x32xf32>
    %14 = vector.broadcast %12 : vector<1x32xf32> to vector<8x32xf32>
    %15 = arith.mulf %11, %14 : vector<8x32xf32>
    %cst_8 = arith.constant dense<0.000000e+00> : vector<8xf32>
    %16 = vector.multi_reduction <add>, %15, %cst_8 [1] : vector<8x32xf32> to vector<8xf32>
    %17 = vector.shape_cast %16 : vector<8xf32> to vector<8x1xf32>
    %18 = vector.broadcast %17 : vector<8x1xf32> to vector<8x32xf32>
    %19 = arith.mulf %0, %18 : vector<8x32xf32>
    %20 = vector.broadcast %13 : vector<1x32xf32> to vector<8x32xf32>
    %21 = arith.addf %19, %20 : vector<8x32xf32>
    %22 = arith.addf %21, %11 : vector<8x32xf32>
    %c2 = arith.constant 2 : index
    %c0_9 = arith.constant 0 : index
    %23 = vector.load %arg2[%c2, %c0_9] : memref<3x32xf32, #tpu.memory_space<vmem>>, vector<1x32xf32>
    %c2_10 = arith.constant 2 : index
    %c0_11 = arith.constant 0 : index
    %24 = vector.load %arg3[%c2_10, %c0_11] : memref<3x32xf32, #tpu.memory_space<vmem>>, vector<1x32xf32>
    %25 = vector.broadcast %23 : vector<1x32xf32> to vector<8x32xf32>
    %26 = arith.mulf %22, %25 : vector<8x32xf32>
    %cst_12 = arith.constant dense<0.000000e+00> : vector<8xf32>
    %27 = vector.multi_reduction <add>, %26, %cst_12 [1] : vector<8x32xf32> to vector<8xf32>
    %28 = vector.shape_cast %27 : vector<8xf32> to vector<8x1xf32>
    %29 = vector.broadcast %28 : vector<8x1xf32> to vector<8x32xf32>
    %30 = arith.mulf %0, %29 : vector<8x32xf32>
    %31 = vector.broadcast %24 : vector<1x32xf32> to vector<8x32xf32>
    %32 = arith.addf %30, %31 : vector<8x32xf32>
    %33 = arith.addf %32, %22 : vector<8x32xf32>
    %c0_13 = arith.constant 0 : index
    %c0_14 = arith.constant 0 : index
    %34 = vector.load %arg4[%c0_13, %c0_14] : memref<8x32xf32, #tpu.memory_space<vmem>>, vector<8x32xf32>
    tpu.vector_store %arg4[%c0_13, %c0_14], %33 {strides = array<i32>} : memref<8x32xf32, #tpu.memory_space<vmem>>, vector<8x32xf32>,
    return
  }
  func.func @transform_0(%arg0: i32) -> (i32, i32) {
    %c0_i32 = arith.constant 0 : i32
    %c0_i32_0 = arith.constant 0 : i32
    return %arg0, %c0_i32 : i32, i32
  }
  func.func @transform_1(%arg0: i32) -> (i32, i32) {
    %c0_i32 = arith.constant 0 : i32
    %c0_i32_0 = arith.constant 0 : i32
    %c0_i32_1 = arith.constant 0 : i32
    return %c0_i32, %c0_i32_0 : i32, i32
  }
  func.func @transform_2(%arg0: i32) -> (i32, i32) {
    %c0_i32 = arith.constant 0 : i32
    %c0_i32_0 = arith.constant 0 : i32
    %c0_i32_1 = arith.constant 0 : i32
    return %c0_i32, %c0_i32_0 : i32, i32
  }
  func.func @transform_3(%arg0: i32) -> (i32, i32) {
    %c0_i32 = arith.constant 0 : i32
    %c0_i32_0 = arith.constant 0 : i32
    return %arg0, %c0_i32 : i32, i32
  }
}

</mosaic_0001>

<bundles_post_ra>
// kernel: tpu_custom_call.1
= control target key start
LH: loop header
LB: loop body
LE: loop exit
PB: predicated region body
PF: predicated region fallthrough
CT: control target
= control target key end

     0   :  { %8 = vsyncpa [#allocation3], 0  ;;  %s262_s0 = inlined_call_operand.hbm [shape: f32[8,32], index: 0, kind: input, shape index: {}]   ;;  %s263_s1 = inlined_call_operand.hbm [shape: f32[3,32], index: 1, kind: input, shape index: {}]   ;;  %s264_s2 = inlined_call_operand.vmem [shape: f32[3,32], index: 2, kind: input, shape index: {}]   ;;  %s265_s3 = inlined_call_operand.hbm [shape: f32[8,32], index: 3, kind: output, shape index: {}]  }
   0x1   :  { %9 = vsyncpa [#allocation6], 0 }
   0x2   :  { %10 = vsyncpa [#allocation4], 0  ;;  %s190_s12 = smov [#allocation2]   ;;  %s191_s14 = smov [#allocation5]  }
   0x3   :  { %s17_s13 = sshll.u32 %s190_s12, 4  ;;  %s27_s15 = sshll.u32 %s191_s14, 4  ;;  %s18_s13 = int_to_ptr.vmem [resolvable:$true] %s17_s13  ;;  %s28_s15 = int_to_ptr.vmem [resolvable:$true] %s27_s15 }
   0x4   :  { %s118_s18 = scalar_lea.hbm %s262_s0, 128 }
   0x5   :  { %p119_p0 = scmp.ne.s32.totalorder %s262_s0, %s118_s18  ;;  %p122_p1 = scmp.lt.u32.totalorder %s118_s18, %s262_s0 }
   0x7   :  { %p124_p2 = pnand %p122_p1, %p119_p0 }
   0x9   :  { %127 = shalt.err (!%p124_p2)
}
   0xa   :  { %s128_s23 = scalar_lea.vmem %s18_s13, 128  ;;  %p133_p4 = scmp.lt.s32.totalorder %s18_s13, %s18_s13 }
   0xb   :  { %p129_p3 = scmp.ne.s32.totalorder %s18_s13, %s128_s23  ;;  %p134_p5 = scmp.lt.s32.totalorder %s128_s23, %s128_s23 }
   0xd   :  { %p135_p6 = por %p134_p5, %p133_p4 }
   0xf   :  { %p136_p7 = pnand %p135_p6, %p129_p3 }
  0x11   :  { %139 = shalt.err (!%p136_p7)
}
  0x12   :  { %20 = dma.hbm_to_vmem [thread:$0]  %s262_s0, 128, %s18_s13, [#allocation3]  }
  0x13   :  { %s140_s28 = scalar_lea.hbm %s263_s1, 64 }
  0x14   :  { %p141_p8 = scmp.ne.s32.totalorder %s263_s1, %s140_s28  ;;  %p144_p9 = scmp.lt.u32.totalorder %s140_s28, %s263_s1 }
  0x16   :  { %p146_p10 = pnand %p144_p9, %p141_p8 }
  0x18   :  { %149 = shalt.err (!%p146_p10)
}
  0x19   :  { %s150_s6 = scalar_lea.vmem %s28_s15, 64  ;;  %p155_p12 = scmp.lt.s32.totalorder %s28_s15, %s28_s15 }
  0x1a   :  { %p151_p11 = scmp.ne.s32.totalorder %s28_s15, %s150_s6  ;;  %p156_p13 = scmp.lt.s32.totalorder %s150_s6, %s150_s6 }
  0x1c   :  { %p157_p0 = por %p156_p13, %p155_p12 }
  0x1e   :  { %p158_p1 = pnand %p157_p0, %p151_p11 }
  0x20   :  { %161 = shalt.err (!%p158_p1)
}
  0x21   :  { %30 = dma.hbm_to_vmem [thread:$0]  %s263_s1, 64, %s28_s15, [#allocation6]  }
  0x22   :  { %184 = dma.done.wait [#allocation3], 128  }
  0x23   :  { %185 = vsyncadd [#allocation3], 4294967168 }
  0x24   :  { %186 = dma.done.wait [#allocation6], 64  }
  0x25   :  { %187 = vsyncadd [#allocation6], 4294967232  ;;  %v39_v0 = vld [vmem:[#allocation2] sm:$0xff]  ;;  %v109_v1 = vld [vmem:[#allocation5] ss:$0 sm:$0xff]  ;;  %vm47_vm0 = vcmask 261120  }
  0x26   :  { %v46_v2 = vmul.f32 %v109_v1, %v39_v0  ;;  %v110_v4 = vld [vmem:[%s264_s2] ss:$0 sm:$0xff]  ;;  %v111_v8 = vld [vmem:[#allocation5 + $0x1] ss:$0 sm:$0xff]  ;;  %v112_v12 = vld [vmem:[%s264_s2 + $0x1] ss:$0 sm:$0xff] }
  0x27   :  { %v113_v16 = vld [vmem:[#allocation5 + $0x2] ss:$0 sm:$0xff]  ;;  %v114_v20 = vld [vmem:[%s264_s2 + $0x2] ss:$0 sm:$0xff]  ;;  %s192_s13 = smov [#allocation7]  }
  0x28   :  { %v48_v3 = vsel %vm47_vm0, %v46_v2, 0.0  ;;  %s99_s14 = sshll.u32 %s192_s13, 4  ;;  %s100_s14 = int_to_ptr.vmem [resolvable:$true] %s99_s14 }
  0x29   :  { %49 = vadd.xlane.f32.xlu0 %v48_v3  ;;  %s162_s15 = scalar_lea.vmem %s100_s14, 128  ;;  %p167_p3 = scmp.lt.s32.totalorder %s100_s14, %s100_s14 }
  0x2a   :  { %p163_p2 = scmp.ne.s32.totalorder %s100_s14, %s162_s15  ;;  %p168_p4 = scmp.lt.s32.totalorder %s162_s15, %s162_s15 }
  0x2c   :  { %p169_p5 = por %p168_p4, %p167_p3 }
  0x2e   :  { %p170_p6 = pnand %p169_p5, %p163_p2 }
  0xb6   :  { %v50_v5 = vpop.xlane.xlu0 %49 }
  0xb7   :  { %v51_v6 = vmul.f32 %v50_v5, %v39_v0 }
  0xb9   :  { %v56_v7 = vadd.f32 %v110_v4, %v51_v6 }
  0xbb   :  { %v57_v9 = vadd.f32 %v56_v7, %v39_v0 }
  0xbd   :  { %v64_v10 = vmul.f32 %v111_v8, %v57_v9 }
  0xbf   :  { %v65_v11 = vsel %vm47_vm0, %v64_v10, 0.0 }
  0xc0   :  { %66 = vadd.xlane.f32.xlu0 %v65_v11 }
 0x14d   :  { %v67_v13 = vpop.xlane.xlu0 %66 }
 0x14e   :  { %v68_v14 = vmul.f32 %v67_v13, %v39_v0 }
 0x150   :  { %v73_v15 = vadd.f32 %v112_v12, %v68_v14 }
 0x152   :  { %v74_v17 = vadd.f32 %v73_v15, %v57_v9 }
 0x154   :  { %v81_v18 = vmul.f32 %v113_v16, %v74_v17 }
 0x156   :  { %v82_v19 = vsel %vm47_vm0, %v81_v18, 0.0 }
 0x157   :  { %83 = vadd.xlane.f32.xlu1 %v82_v19 }
 0x1e4   :  { %v84_v21 = vpop.xlane.xlu1 %83 }
 0x1e5   :  { %v85_v22 = vmul.f32 %v84_v21, %v39_v0 }
 0x1e7   :  { %v90_v23 = vadd.f32 %v114_v20, %v85_v22 }
 0x1e9   :  { %v91_v24 = vadd.f32 %v90_v23, %v74_v17 }
 0x1eb   :  { %92 = vst.msk [vmem:[#allocation7] sm:$0xff] %vm47_vm0, %v91_v24 }
 0x1ec   :  { %173 = shalt.err (!%p170_p6)
}
 0x1ed   :  { %s174_s2 = scalar_lea.hbm %s265_s3, 128 }
 0x1ee   :  { %p175_p7 = scmp.ne.s32.totalorder %s265_s3, %s174_s2  ;;  %p178_p8 = scmp.lt.u32.totalorder %s174_s2, %s265_s3 }
 0x1f0   :  { %p180_p9 = pnand %p178_p8, %p175_p7 }
 0x1f2   :  { %183 = shalt.err (!%p180_p9)
}
 0x1f3   :  { %102 = dma.vmem_to_hbm [thread:$0]  %s100_s14, 128, %s265_s3, [#allocation4]  }
 0x1f4   :  { %188 = dma.done.wait [#allocation4], 128  }
 0x1f5   :  { %189 = vsyncadd [#allocation4], 4294967168 }
 0x1f6   :  { %106 = vsyncpa [#allocation3], 1 }
 0x1f7   :  { %107 = vsyncpa [#allocation6], 1 }
 0x1f8   :  { %108 = vsyncpa [#allocation4], 1 }

</bundles_post_ra>
